<compile_context>
chip_gen: v6e
topology: v6e:2x2x1
jax: 0.10.0
libtpu: 0.0.40
codegen_flags: <defaults>
</compile_context>

<pallas_src>
import numpy as np
import jax
import jax.numpy as jnp
from jax import lax
from jax.experimental import pallas as pl
from jax.experimental.pallas import tpu as pltpu


def _round_up(x, m):
    return (x + m - 1) // m * m


def _cdiv(a, b):
    return (a + b - 1) // b


def _features_linear_kernel(idx_ref, embt_ref, bias_ref, out_ref, acc_ref):
    # idx_ref : VMEM (F, tb)  int32  -- gather indices for this batch tile (batch on lanes)
    # embt_ref: VMEM (D, tv)  f32    -- this vocab chunk of the transposed embedding table
    # bias_ref: VMEM (D, 1)   f32    -- resident
    # out_ref : VMEM (D, tb)  f32    -- lane-dense output tile (batch on lanes)
    # acc_ref : VMEM (D, tb)  f32    -- accumulator, resident across the vocab grid axis
    k = pl.program_id(1)
    num_fields, tb = idx_ref.shape
    tv = embt_ref.shape[1]

    @pl.when(k == 0)
    def _():
        acc_ref[...] = jnp.zeros_like(acc_ref)

    idx = idx_ref[...]                                       # (F, tb) int32, one load
    # Transposed multi-hot for this vocab chunk: Mt[v, b] = #fields selecting row (k*tv + v).
    row_ids = lax.broadcasted_iota(jnp.int32, (tv, tb), 0) + k * tv
    mh = (row_ids == idx[0:1, :]).astype(jnp.float32)
    for f in range(1, num_fields):                           # static unroll, F is tiny
        mh = mh + (row_ids == idx[f:f + 1, :]).astype(jnp.float32)

    # Gather-and-sum as one MXU matmul: (D, tv) @ (tv, tb) -> (D, tb), f32 accumulation.
    acc_ref[...] += jnp.dot(embt_ref[...], mh,
                            preferred_element_type=jnp.float32,
                            precision=lax.Precision.HIGHEST)

    @pl.when(k == pl.num_programs(1) - 1)
    def _():
        out_ref[...] = (acc_ref[...] + bias_ref[...]).astype(out_ref.dtype)


def features_linear(x, offsets, emb, bias, *, max_tb=1024, max_tv=1024):
    """x: (B, F) int, offsets: (F,) int, emb: (V, D) f32, bias: (D,) f32 -> (B, D) f32."""
    B, F = x.shape
    V, D = emb.shape
    assert V < 2**31, "vocab must be addressable with int32"

    # idx = x + offsets; clip OOB (torch.nn.Embedding would raise) — documented deviation.
    idx = jnp.clip(x.astype(jnp.int32) + offsets.reshape(1, F).astype(jnp.int32), 0, V - 1)

    # Batch tile: multiple of 128 (unmasked lane-dense stores).  Ensure >= 2 tiles when the
    # batch is big enough so both v7x TensorCores get work on the "parallel" axis.
    tb = min(max_tb, _round_up(B, 128))
    if B > 128 and _cdiv(B, tb) < 2:
        tb = _round_up(_cdiv(B, 2), 128)
    B_pad = _round_up(B, tb)
    n_b = B_pad // tb

    # Vocab chunk: multiple of 128; chunks stream (double-buffered) from HBM via BlockSpec.
    tv = min(max_tv, _round_up(V, 128))
    V_pad = _round_up(V, tv)
    n_v = V_pad // tv

    # Transposed, padded operands (batch / vocab on the lane axis inside the kernel).
    idx_t = jnp.full((F, B_pad), -1, jnp.int32).at[:, :B].set(idx.T)   # pad cols match nothing
    embt = jnp.zeros((D, V_pad), jnp.float32).at[:, :V].set(emb.astype(jnp.float32).T)
    bias2d = bias.reshape(D, 1).astype(jnp.float32)

    # VMEM budget, clamped to the actual chip capacity (v7x: 64 MiB per TensorCore).
    try:
        vmem_cap = int(getattr(pltpu.get_tpu_info(), "vmem_capacity_bytes", 64 * 2**20))
    except Exception:
        vmem_cap = 64 * 2**20
    est = (2 * (F * tb + D * tv) * 4      # double-buffered idx + emb-chunk tiles
           + 3 * D * tb * 4               # out tile (2 bufs) + accumulator scratch
           + 4 * tv * tb * 4)             # iota / compare / multi-hot transients + slack
    vmem_limit = int(min(int(0.9 * vmem_cap), max(32 * 2**20, 2 * est)))

    out_t = pl.pallas_call(
        _features_linear_kernel,
        out_shape=jax.ShapeDtypeStruct((D, B_pad), jnp.float32),
        grid_spec=pltpu.PrefetchScalarGridSpec(
            num_scalar_prefetch=0,
            grid=(n_b, n_v),                                  # reduction (vocab) axis last
            in_specs=[
                pl.BlockSpec((F, tb), lambda i, k: (0, i)),   # indices, per batch tile
                pl.BlockSpec((D, tv), lambda i, k: (0, k)),   # emb chunk, per vocab chunk
                pl.BlockSpec((D, 1), lambda i, k: (0, 0)),    # bias, resident
            ],
            out_specs=pl.BlockSpec((D, tb), lambda i, k: (0, i)),
            scratch_shapes=[pltpu.VMEM((D, tb), jnp.float32)],
        ),
        compiler_params=pltpu.CompilerParams(
            dimension_semantics=("parallel", "arbitrary"),
            vmem_limit_bytes=vmem_limit,
        ),
        cost_estimate=pl.CostEstimate(
            flops=2 * B_pad * V_pad * D + B_pad * V_pad * F,
            transcendentals=0,
            bytes_accessed=(V_pad * D + B_pad * F + B_pad * D + D) * 4,
        ),
    )(idx_t, embt, bias2d)

    return out_t[:, :B].T  # (B, D)


if __name__ == "__main__":
    # Module config (small, synthetic) — matches FeaturesLinear(field_dims, output_dim=1).
    field_dims = (3, 5, 7, 9)          # num_fields = 4, vocab = 24
    output_dim = 1
    B = 2
    F = len(field_dims)
    V = int(np.sum(field_dims))

    key = jax.random.PRNGKey(0)
    k_emb, k_x = jax.random.split(key)
    emb = jax.random.normal(k_emb, (V, output_dim), dtype=jnp.float32)
    bias = jnp.zeros((output_dim,), dtype=jnp.float32)

    # offsets = (0, cumsum(field_dims)[:-1])
    offsets = jnp.asarray(np.array((0, *np.cumsum(field_dims)[:-1]), dtype=np.int32))

    # Per-field indices: x[:, f] in [0, field_dims[f])
    x_cols = []
    for fd in field_dims:
        k_x, sub = jax.random.split(k_x)
        x_cols.append(jax.random.randint(sub, (B, 1), 0, fd, dtype=jnp.int32))
    x = jnp.concatenate(x_cols, axis=1)  # (B, F) int32

    out = features_linear(x, offsets, emb, bias)
    jax.block_until_ready(out)

    # Pure-JAX reference: gather + sum over fields + bias.
    ref = jnp.take(emb, x + offsets[None, :], axis=0).sum(axis=1) + bias[None, :]
    assert out.shape == (B, output_dim)
    np.testing.assert_allclose(np.asarray(out), np.asarray(ref), rtol=1e-5, atol=1e-5)

    print("KERNEL_OK")
</pallas_src>

<mosaic_0001>
module attributes {stable_mosaic.version = 11 : i64} {
  func.func @_features_linear_kernel(%arg0: i32, %arg1: i32, %arg2: memref<4x128xi32, #tpu.memory_space<vmem>>, %arg3: memref<1x128xf32, #tpu.memory_space<vmem>>, %arg4: memref<1x1xf32, #tpu.memory_space<vmem>>, %arg5: memref<1x128xf32, #tpu.memory_space<vmem>>, %arg6: memref<1x128xf32, #tpu.memory_space<vmem>>) attributes {dimension_semantics = [#tpu.dimension_semantics<parallel>, #tpu.dimension_semantics<arbitrary>], iteration_bounds = array<i64: 1, 1>, scalar_prefetch = 0 : i64, scratch_operands = 1 : i64, tpu.core_type = #tpu.core_type<tc>, window_params = [{transform_indices = @transform_0, window_bounds = array<i64: 4, 128>}, {transform_indices = @transform_1, window_bounds = array<i64: 1, 128>}, {pipeline_mode = #tpu.pipeline_mode<synchronous>, transform_indices = @transform_2, window_bounds = array<i64: 1, 1>}, {transform_indices = @transform_3, window_bounds = array<i64: 1, 128>}]} {
    %c0_i32 = arith.constant 0 : i32
    %0 = arith.cmpi eq, %arg1, %c0_i32 : i32
    %1 = arith.extui %0 : i1 to i32
    %c0_i32_0 = arith.constant 0 : i32
    %2 = arith.cmpi ne, %1, %c0_i32_0 : i32
    scf.if %2 {
      %cst_10 = arith.constant 0.000000e+00 : f32
      %39 = vector.broadcast %cst_10 : f32 to vector<1x128xf32>
      %c0_11 = arith.constant 0 : index
      %c0_12 = arith.constant 0 : index
      %40 = vector.load %arg6[%c0_11, %c0_12] : memref<1x128xf32, #tpu.memory_space<vmem>>, vector<1x128xf32>
      tpu.vector_store %arg6[%c0_11, %c0_12], %39 {strides = array<i32>} : memref<1x128xf32, #tpu.memory_space<vmem>>, vector<1x128xf32>,
    } else {
    }
    %c0 = arith.constant 0 : index
    %c0_1 = arith.constant 0 : index
    %3 = vector.load %arg2[%c0, %c0_1] : memref<4x128xi32, #tpu.memory_space<vmem>>, vector<4x128xi32>
    %4 = tpu.iota {dimensions = array<i32: 0>} : vector<128x128xi32>
    %c128_i32 = arith.constant 128 : i32
    %5 = arith.muli %arg1, %c128_i32 : i32
    %6 = vector.broadcast %5 : i32 to vector<128x128xi32>
    %7 = arith.addi %4, %6 : vector<128x128xi32>
    %8 = vector.extract_strided_slice %3 {offsets = [0, 0], sizes = [1, 128], strides = [1, 1]} : vector<4x128xi32> to vector<1x128xi32>
    %9 = vector.broadcast %8 : vector<1x128xi32> to vector<128x128xi32>
    %10 = arith.cmpi eq, %7, %9 : vector<128x128xi32>
    %11 = arith.extui %10 : vector<128x128xi1> to vector<128x128xi32>
    %12 = arith.sitofp %11 : vector<128x128xi32> to vector<128x128xf32>
    %13 = vector.extract_strided_slice %3 {offsets = [1, 0], sizes = [1, 128], strides = [1, 1]} : vector<4x128xi32> to vector<1x128xi32>
    %14 = vector.broadcast %13 : vector<1x128xi32> to vector<128x128xi32>
    %15 = arith.cmpi eq, %7, %14 : vector<128x128xi32>
    %16 = arith.extui %15 : vector<128x128xi1> to vector<128x128xi32>
    %17 = arith.sitofp %16 : vector<128x128xi32> to vector<128x128xf32>
    %18 = arith.addf %12, %17 : vector<128x128xf32>
    %19 = vector.extract_strided_slice %3 {offsets = [2, 0], sizes = [1, 128], strides = [1, 1]} : vector<4x128xi32> to vector<1x128xi32>
    %20 = vector.broadcast %19 : vector<1x128xi32> to vector<128x128xi32>
    %21 = arith.cmpi eq, %7, %20 : vector<128x128xi32>
    %22 = arith.extui %21 : vector<128x128xi1> to vector<128x128xi32>
    %23 = arith.sitofp %22 : vector<128x128xi32> to vector<128x128xf32>
    %24 = arith.addf %18, %23 : vector<128x128xf32>
    %25 = vector.extract_strided_slice %3 {offsets = [3, 0], sizes = [1, 128], strides = [1, 1]} : vector<4x128xi32> to vector<1x128xi32>
    %26 = vector.broadcast %25 : vector<1x128xi32> to vector<128x128xi32>
    %27 = arith.cmpi eq, %7, %26 : vector<128x128xi32>
    %28 = arith.extui %27 : vector<128x128xi1> to vector<128x128xi32>
    %29 = arith.sitofp %28 : vector<128x128xi32> to vector<128x128xf32>
    %30 = arith.addf %24, %29 : vector<128x128xf32>
    %c0_2 = arith.constant 0 : index
    %c0_3 = arith.constant 0 : index
    %31 = vector.load %arg6[%c0_2, %c0_3] : memref<1x128xf32, #tpu.memory_space<vmem>>, vector<1x128xf32>
    %c0_4 = arith.constant 0 : index
    %c0_5 = arith.constant 0 : index
    %32 = vector.load %arg3[%c0_4, %c0_5] : memref<1x128xf32, #tpu.memory_space<vmem>>, vector<1x128xf32>
    %cst = arith.constant dense<0.000000e+00> : vector<1x128xf32>
    %33 = tpu.matmul %32, %30, %cst {dimension_numbers = #tpu.dot_dimension_numbers<[1], [0], [0], [1], [0, 0, 1, 1], [], []>, precision = #tpu.contract_precision<fp32>} : vector<1x128xf32>, vector<128x128xf32>, vector<1x128xf32> -> vector<1x128xf32>
    %34 = arith.addf %31, %33 : vector<1x128xf32>
    %c0_6 = arith.constant 0 : index
    %c0_7 = arith.constant 0 : index
    %35 = vector.load %arg6[%c0_6, %c0_7] : memref<1x128xf32, #tpu.memory_space<vmem>>, vector<1x128xf32>
    tpu.vector_store %arg6[%c0_6, %c0_7], %34 {strides = array<i32>} : memref<1x128xf32, #tpu.memory_space<vmem>>, vector<1x128xf32>,
    %c0_i32_8 = arith.constant 0 : i32
    %36 = arith.cmpi eq, %arg1, %c0_i32_8 : i32
    %37 = arith.extui %36 : i1 to i32
    %c0_i32_9 = arith.constant 0 : i32
    %38 = arith.cmpi ne, %37, %c0_i32_9 : i32
    scf.if %38 {
      %c0_10 = arith.constant 0 : index
      %c0_11 = arith.constant 0 : index
      %39 = vector.load %arg6[%c0_10, %c0_11] : memref<1x128xf32, #tpu.memory_space<vmem>>, vector<1x128xf32>
      %c0_12 = arith.constant 0 : index
      %c0_13 = arith.constant 0 : index
      %40 = vector.load %arg4[%c0_12, %c0_13] : memref<1x1xf32, #tpu.memory_space<vmem>>, vector<1x1xf32>
      %41 = vector.broadcast %40 : vector<1x1xf32> to vector<1x128xf32>
      %42 = arith.addf %39, %41 : vector<1x128xf32>
      %c0_14 = arith.constant 0 : index
      %c0_15 = arith.constant 0 : index
      %43 = vector.load %arg5[%c0_14, %c0_15] : memref<1x128xf32, #tpu.memory_space<vmem>>, vector<1x128xf32>
      tpu.vector_store %arg5[%c0_14, %c0_15], %42 {strides = array<i32>} : memref<1x128xf32, #tpu.memory_space<vmem>>, vector<1x128xf32>,
    } else {
    }
    return
  }
  func.func @transform_0(%arg0: i32, %arg1: i32) -> (i32, i32) {
    %c0_i32 = arith.constant 0 : i32
    %c0_i32_0 = arith.constant 0 : i32
    return %c0_i32, %arg0 : i32, i32
  }
  func.func @transform_1(%arg0: i32, %arg1: i32) -> (i32, i32) {
    %c0_i32 = arith.constant 0 : i32
    %c0_i32_0 = arith.constant 0 : i32
    return %c0_i32, %arg1 : i32, i32
  }
  func.func @transform_2(%arg0: i32, %arg1: i32) -> (i32, i32) {
    %c0_i32 = arith.constant 0 : i32
    %c0_i32_0 = arith.constant 0 : i32
    %c0_i32_1 = arith.constant 0 : i32
    return %c0_i32, %c0_i32_0 : i32, i32
  }
  func.func @transform_3(%arg0: i32, %arg1: i32) -> (i32, i32) {
    %c0_i32 = arith.constant 0 : i32
    %c0_i32_0 = arith.constant 0 : i32
    return %c0_i32, %arg0 : i32, i32
  }
}

</mosaic_0001>

<bundles_post_ra>
// kernel: tpu_custom_call.1
= control target key start
LH: loop header
LB: loop body
LE: loop exit
PB: predicated region body
PF: predicated region fallthrough
CT: control target
= control target key end

     0   :  { %s2102_s0 = inlined_call_operand.hbm [shape: s32[4,128], index: 0, kind: input, shape index: {}]   ;;  %s2103_s1 = inlined_call_operand.vmem [shape: f32[1,128], index: 1, kind: input, shape index: {}]   ;;  %s2104_s2 = inlined_call_operand.<no memory space> [shape: f32[1,1], index: 2, kind: input, shape index: {}]   ;;  %s2105_s3 = inlined_call_operand.hbm [shape: f32[1,128], index: 3, kind: output, shape index: {}]  }
   0x1   :  { %v8_v0 = vstv %s2104_s2 }
   0x2   :  { %9 = vst [vmem:[#allocation3] sm:$0x1] %v8_v0 }
   0x3   :  { %10 = vsyncpa [#allocation5], 0 }
   0x4   :  { %11 = vsyncpa [#allocation6], 0  ;;  %s1428_s14 = smov [#allocation4]  }
   0x5   :  { %s18_s15 = sshll.u32 %s1428_s14, 4  ;;  %s19_s15 = int_to_ptr.vmem [resolvable:$true] %s18_s15 }
   0x6   :  { %s1392_s16 = scalar_lea.vmem %s19_s15, 64  ;;  %p1397_p1 = scmp.lt.s32.totalorder %s19_s15, %s19_s15 }
   0x7   :  { %p1393_p0 = scmp.ne.s32.totalorder %s19_s15, %s1392_s16  ;;  %p1398_p2 = scmp.lt.s32.totalorder %s1392_s16, %s1392_s16 }
   0x9   :  { %p1399_p3 = por %p1398_p2, %p1397_p1 }
   0xb   :  { %p1400_p4 = pnand %p1399_p3, %p1393_p0 }
   0xd   :  { %1403 = shalt.err (!%p1400_p4)
}
   0xe   :  { %21 = dma.hbm_to_vmem [thread:$0]  %s2102_s0, 64, %s19_s15, [#allocation5]  }
   0xf   :  { %1424 = dma.done.wait [#allocation5], 64  }
  0x10   :  { %1425 = vsyncadd [#allocation5], 4294967232  ;;  %v35_v1 = vlaneseq  ;;  %v1429_v2 = vmov 0.0   ;;  %vm1430_vm0 = vmmov 0   ;;  %v34_v16 = vld [vmem:[#allocation4] sm:$0xf] }
  0x11   :  { %1168 = vmatprep.subr.mxu0 %v1429_v2  ;;  %33 = vst [vmem:[#allocation2] sm:$0x1] %v1429_v2  ;;  %1203 = vmatprep.subr.mxu1 %v1429_v2  ;;  %v1515_v25 = vld [vmem:[%s2103_s1] sm:$0x1]  ;;  %s1432_s1 = smov [#allocation7]  }
  0x12   :  { %v1462_v3 = vshrl.u32 %v35_v1, 7  ;;  %1200 = vmatprep.mubr.msk.f32.mxu0 %vm1430_vm0, %v1429_v2  ;;  %1235 = vmatprep.mubr.msk.f32.mxu1 %vm1430_vm0, %v1429_v2  ;;  %v1527_v29 = vand.u32 4294901760, %v1515_v25  ;;  %s993_s19 = sshll.u32 %s1432_s1, 4  ;;  %s994_s19 = int_to_ptr.vmem [resolvable:$true] %s993_s19 }
  0x13   :  { %s1404_s20 = scalar_lea.vmem %s994_s19, 16  ;;  %s1408_s21 = scalar_lea.vmem %s994_s19, 32 }
  0x14   :  { %v51_v4 = vadd.s32 120, %v1462_v3  ;;  %v72_v5 = vsub.s32 0, %v1462_v3  ;;  %v124_v6 = vsub.s32 1, %v1462_v3  ;;  %v192_v7 = vsub.s32 2, %v1462_v3  ;;  %p1405_p5 = scmp.ne.s32.totalorder %s994_s19, %s1404_s20  ;;  %p1409_p6 = scmp.lt.s32.totalorder %s994_s19, %s994_s19 }
  0x15   :  { %v260_v8 = vsub.s32 3, %v1462_v3  ;;  %v50_v9 = vadd.s32 112, %v1462_v3  ;;  %v49_v10 = vadd.s32 104, %v1462_v3  ;;  %v1476_v11 = vadd.s32 96, %v1462_v3  ;;  %p1410_p7 = scmp.lt.s32.totalorder %s1408_s21, %s1404_s20 }
  0x16   :  { %v1479_v12 = vadd.s32 88, %v1462_v3  ;;  %v1482_v13 = vadd.s32 80, %v1462_v3  ;;  %v1485_v14 = vadd.s32 72, %v1462_v3  ;;  %v1488_v15 = vadd.s32 64, %v1462_v3 }
  0x17   :  { %v1491_v17 = vadd.s32 56, %v1462_v3  ;;  %v1494_v18 = vadd.s32 48, %v1462_v3  ;;  %v1497_v19 = vadd.s32 40, %v1462_v3  ;;  %v1500_v20 = vadd.s32 32, %v1462_v3  ;;  %p1411_p8 = por %p1410_p7, %p1409_p6 }
  0x18   :  { %v1504_v21 = vrot.slane %v34_v16, %v72_v5  ;;  %v1506_v22 = vrot.slane %v34_v16, %v124_v6  ;;  %v1508_v23 = vrot.slane %v34_v16, %v192_v7  ;;  %v1510_v24 = vrot.slane %v34_v16, %v260_v8 }
  0x19   :  { %v1518_v26 = vadd.s32 24, %v1462_v3  ;;  %v1521_v27 = vadd.s32 16, %v1462_v3  ;;  %v1524_v28 = vadd.s32 8, %v1462_v3  ;;  %p1412_p9 = pnand %p1411_p8, %p1405_p5 }
  0x1a   :  { %vm89_vm1 = vcmp.eq.s32.totalorder %v51_v4, %v1504_v21  ;;  %vm141_vm2 = vcmp.eq.s32.totalorder %v51_v4, %v1506_v22  ;;  %vm209_vm3 = vcmp.eq.s32.totalorder %v51_v4, %v1508_v23  ;;  %vm277_vm4 = vcmp.eq.s32.totalorder %v51_v4, %v1510_v24 }
  0x1b   :  { %v1017_v30 = vsel %vm89_vm1, 1.0, %v1429_v2  ;;  %v1033_v31 = vsel %vm141_vm2, 1.0, %v1429_v2  ;;  %v1049_v32 = vsel %vm209_vm3, 1.0, %v1429_v2  ;;  %v1065_v33 = vsel %vm277_vm4, 1.0, %v1429_v2 }
  0x1c   :  { %v189_v34 = vadd.f32 %v1033_v31, %v1017_v30  ;;  %vm88_vm5 = vcmp.eq.s32.totalorder %v50_v9, %v1504_v21  ;;  %vm140_vm6 = vcmp.eq.s32.totalorder %v50_v9, %v1506_v22  ;;  %vm208_vm7 = vcmp.eq.s32.totalorder %v50_v9, %v1508_v23 }
  0x1d   :  { %v1016_v35 = vsel %vm88_vm5, 1.0, %v1429_v2  ;;  %v1032_v36 = vsel %vm140_vm6, 1.0, %v1429_v2  ;;  %v1048_v37 = vsel %vm208_vm7, 1.0, %v1429_v2  ;;  %vm276_vm8 = vcmp.eq.s32.totalorder %v50_v9, %v1510_v24 }
  0x1e   :  { %v257_v38 = vadd.f32 %v1049_v32, %v189_v34  ;;  %v188_v39 = vadd.f32 %v1032_v36, %v1016_v35  ;;  %v1064_v40 = vsel %vm276_vm8, 1.0, %v1429_v2  ;;  %vm87_vm9 = vcmp.eq.s32.totalorder %v49_v10, %v1504_v21 }
  0x1f   :  { %v1015_v41 = vsel %vm87_vm9, 1.0, %v1429_v2  ;;  %vm139_vm10 = vcmp.eq.s32.totalorder %v49_v10, %v1506_v22  ;;  %vm207_vm11 = vcmp.eq.s32.totalorder %v49_v10, %v1508_v23  ;;  %vm275_vm12 = vcmp.eq.s32.totalorder %v49_v10, %v1510_v24 }
  0x20   :  { %v325_v42 = vadd.f32 %v1065_v33, %v257_v38  ;;  %v256_v43 = vadd.f32 %v1048_v37, %v188_v39  ;;  %v1031_v44 = vsel %vm139_vm10, 1.0, %v1429_v2  ;;  %v1047_v45 = vsel %vm207_vm11, 1.0, %v1429_v2 }
  0x21   :  { %v187_v46 = vadd.f32 %v1031_v44, %v1015_v41  ;;  %v1063_v47 = vsel %vm275_vm12, 1.0, %v1429_v2  ;;  %vm86_vm13 = vcmp.eq.s32.totalorder %v1476_v11, %v1504_v21  ;;  %vm138_vm14 = vcmp.eq.s32.totalorder %v1476_v11, %v1506_v22 }
  0x22   :  { %v1557_v48 = vand.u32 4294901760, %v325_v42  ;;  %v324_v49 = vadd.f32 %v1064_v40, %v256_v43  ;;  %v1014_v50 = vsel %vm86_vm13, 1.0, %v1429_v2  ;;  %v1030_v51 = vsel %vm138_vm14, 1.0, %v1429_v2 }
  0x23   :  { %v255_v52 = vadd.f32 %v1047_v45, %v187_v46  ;;  %v186_v53 = vadd.f32 %v1030_v51, %v1014_v50  ;;  %vm206_vm15 = vcmp.eq.s32.totalorder %v1476_v11, %v1508_v23  ;;  %vm274_vm1 = vcmp.eq.s32.totalorder %v1476_v11, %v1510_v24 }
  0x24   :  { %1169 = vmatpush3.msra.mxu0 %v1557_v48  ;;  %v1566_v54 = vand.u32 4294901760, %v324_v49  ;;  %v1046_v55 = vsel %vm206_vm15, 1.0, %v1429_v2  ;;  %v1062_v56 = vsel %vm274_vm1, 1.0, %v1429_v2  ;;  %vm85_vm2 = vcmp.eq.s32.totalorder %v1479_v12, %v1504_v21 }
  0x25   :  { %1170 = vmatprep.subr.mxu0 %v1429_v2  ;;  %v323_v57 = vadd.f32 %v1063_v47, %v255_v52  ;;  %v254_v58 = vadd.f32 %v1046_v55, %v186_v53  ;;  %v1013_v59 = vsel %vm85_vm2, 1.0, %v1429_v2  ;;  %vm137_vm3 = vcmp.eq.s32.totalorder %v1479_v12, %v1506_v22 }
  0x26   :  { %1171 = vmatpush3.msra.mxu0 %v1566_v54  ;;  %v1029_v60 = vsel %vm137_vm3, 1.0, %v1429_v2  ;;  %vm205_vm4 = vcmp.eq.s32.totalorder %v1479_v12, %v1508_v23  ;;  %vm273_vm5 = vcmp.eq.s32.totalorder %v1479_v12, %v1510_v24  ;;  %v1583_v61 = vsub.f32 %v325_v42, %v1557_v48 }
  0x27   :  { %1172 = vmatprep.subr.mxu0 %v1429_v2  ;;  %v1586_v62 = vand.u32 4294901760, %v323_v57  ;;  %v322_v63 = vadd.f32 %v1062_v56, %v254_v58  ;;  %v185_v0 = vadd.f32 %v1029_v60, %v1013_v59  ;;  %v1045_v1 = vsel %vm205_vm4, 1.0, %v1429_v2 }
  0x28   :  { %v1061_v4 = vsel %vm273_vm5, 1.0, %v1429_v2  ;;  %v422_v6 = vand.u32 4294901760, %v1583_v61  ;;  %vm84_vm6 = vcmp.eq.s32.totalorder %v1482_v13, %v1504_v21  ;;  %vm136_vm7 = vcmp.eq.s32.totalorder %v1482_v13, %v1506_v22 }
  0x29   :  { %1173 = vmatpush3.msra.mxu0 %v1586_v62  ;;  %v1596_v7 = vand.u32 4294901760, %v322_v63  ;;  %v253_v8 = vadd.f32 %v1045_v1, %v185_v0  ;;  %v1012_v9 = vsel %vm84_vm6, 1.0, %v1429_v2  ;;  %v1028_v10 = vsel %vm136_vm7, 1.0, %v1429_v2 }
  0x2a   :  { %1174 = vmatprep.subr.mxu0 %v1429_v2  ;;  %v423_v11 = vsub.f32 %v1583_v61, %v422_v6  ;;  %v184_v12 = vadd.f32 %v1028_v10, %v1012_v9  ;;  %vm204_vm8 = vcmp.eq.s32.totalorder %v1482_v13, %v1508_v23  ;;  %vm272_vm9 = vcmp.eq.s32.totalorder %v1482_v13, %v1510_v24 }
  0x2b   :  { %1175 = vmatpush3.msra.mxu0 %v1596_v7  ;;  %v1609_v16 = vadd.f32 %v1061_v4, %v253_v8  ;;  %v1044_v30 = vsel %vm204_vm8, 1.0, %v1429_v2  ;;  %v1060_v31 = vsel %vm272_vm9, 1.0, %v1429_v2  ;;  %v1614_v32 = vsub.f32 %v324_v49, %v1566_v54 }
  0x2c   :  { %1176 = vmatprep.subr.mxu0 %v1429_v2  ;;  %v424_v33 = vand.u32 4294901760, %v423_v11  ;;  %v252_v34 = vadd.f32 %v1044_v30, %v184_v12  ;;  %vm83_vm10 = vcmp.eq.s32.totalorder %v1485_v14, %v1504_v21  ;;  %vm135_vm11 = vcmp.eq.s32.totalorder %v1485_v14, %v1506_v22 }
  0x2d   :  { %v1622_v13 = vand.u32 4294901760, %v1609_v16  ;;  %v429_v35 = vand.u32 4294901760, %v1614_v32  ;;  %v1011_v36 = vsel %vm83_vm10, 1.0, %v1429_v2  ;;  %v1027_v37 = vsel %vm135_vm11, 1.0, %v1429_v2 }
  0x2e   :  { %1204 = vmatpush3.msra.mxu1 %v424_v33  ;;  %v1627_v38 = vadd.f32 %v1060_v31, %v252_v34  ;;  %v183_v39 = vadd.f32 %v1027_v37, %v1011_v36  ;;  %vm203_vm12 = vcmp.eq.s32.totalorder %v1485_v14, %v1508_v23  ;;  %vm271_vm13 = vcmp.eq.s32.totalorder %v1485_v14, %v1510_v24 }
  0x2f   :  { %1177 = vmatpush3.msra.mxu0 %v1622_v13  ;;  %1205 = vmatprep.subr.mxu1 %v1429_v2  ;;  %v430_v40 = vsub.f32 %v1614_v32, %v429_v35  ;;  %v1043_v41 = vsel %vm203_vm12, 1.0, %v1429_v2  ;;  %v1059_v42 = vsel %vm271_vm13, 1.0, %v1429_v2  ;;  %v1641_v43 = vsub.f32 %v323_v57, %v1586_v62 }
  0x30   :  { %1178 = vmatprep.subr.mxu0 %v1429_v2  ;;  %v1645_v44 = vand.u32 4294901760, %v1627_v38  ;;  %v251_v14 = vadd.f32 %v1043_v41, %v183_v39  ;;  %vm82_vm14 = vcmp.eq.s32.totalorder %v1488_v15, %v1504_v21  ;;  %vm134_vm15 = vcmp.eq.s32.totalorder %v1488_v15, %v1506_v22 }
  0x31   :  { %v431_v45 = vand.u32 4294901760, %v430_v40  ;;  %v436_v46 = vand.u32 4294901760, %v1641_v43  ;;  %v1010_v47 = vsel %vm82_vm14, 1.0, %v1429_v2  ;;  %v1026_v49 = vsel %vm134_vm15, 1.0, %v1429_v2 }
  0x32   :  { %1179 = vmatpush3.msra.mxu0 %v1645_v44  ;;  %v1655_v50 = vadd.f32 %v1059_v42, %v251_v14  ;;  %v182_v51 = vadd.f32 %v1026_v49, %v1010_v47  ;;  %vm202_vm1 = vcmp.eq.s32.totalorder %v1488_v15, %v1508_v23  ;;  %vm270_vm2 = vcmp.eq.s32.totalorder %v1488_v15, %v1510_v24 }
  0x33   :  { %1206 = vmatpush3.msra.mxu1 %v431_v45  ;;  %1180 = vmatprep.subr.mxu0 %v1429_v2  ;;  %v437_v52 = vsub.f32 %v1641_v43, %v436_v46  ;;  %v1042_v53 = vsel %vm202_vm1, 1.0, %v1429_v2  ;;  %v1058_v55 = vsel %vm270_vm2, 1.0, %v1429_v2  ;;  %v1668_v56 = vsub.f32 %v322_v63, %v1596_v7 }
  0x34   :  { %1207 = vmatprep.subr.mxu1 %v1429_v2  ;;  %v1672_v57 = vand.u32 4294901760, %v1655_v50  ;;  %v250_v15 = vadd.f32 %v1042_v53, %v182_v51  ;;  %vm81_vm3 = vcmp.eq.s32.totalorder %v1491_v17, %v1504_v21  ;;  %vm133_vm4 = vcmp.eq.s32.totalorder %v1491_v17, %v1506_v22 }
  0x35   :  { %v438_v58 = vand.u32 4294901760, %v437_v52  ;;  %v443_v59 = vand.u32 4294901760, %v1668_v56  ;;  %v1009_v60 = vsel %vm81_vm3, 1.0, %v1429_v2  ;;  %v1025_v63 = vsel %vm133_vm4, 1.0, %v1429_v2 }
  0x36   :  { %1181 = vmatpush3.msra.mxu0 %v1672_v57  ;;  %v1682_v0 = vadd.f32 %v1058_v55, %v250_v15  ;;  %v181_v1 = vadd.f32 %v1025_v63, %v1009_v60  ;;  %vm201_vm5 = vcmp.eq.s32.totalorder %v1491_v17, %v1508_v23  ;;  %vm269_vm6 = vcmp.eq.s32.totalorder %v1491_v17, %v1510_v24 }
  0x37   :  { %1208 = vmatpush3.msra.mxu1 %v438_v58  ;;  %1182 = vmatprep.subr.mxu0 %v1429_v2  ;;  %v444_v4 = vsub.f32 %v1668_v56, %v443_v59  ;;  %v1041_v8 = vsel %vm201_vm5, 1.0, %v1429_v2  ;;  %v1057_v9 = vsel %vm269_vm6, 1.0, %v1429_v2  ;;  %v1696_v10 = vsub.f32 %v1609_v16, %v1622_v13 }
  0x38   :  { %1209 = vmatprep.subr.mxu1 %v1429_v2  ;;  %v1700_v11 = vand.u32 4294901760, %v1682_v0  ;;  %v249_v17 = vadd.f32 %v1041_v8, %v181_v1  ;;  %vm80_vm7 = vcmp.eq.s32.totalorder %v1494_v18, %v1504_v21  ;;  %vm132_vm8 = vcmp.eq.s32.totalorder %v1494_v18, %v1506_v22 }
  0x39   :  { %v445_v12 = vand.u32 4294901760, %v444_v4  ;;  %v450_v30 = vand.u32 4294901760, %v1696_v10  ;;  %v1008_v31 = vsel %vm80_vm7, 1.0, %v1429_v2  ;;  %v1024_v16 = vsel %vm132_vm8, 1.0, %v1429_v2 }
  0x3a   :  { %1183 = vmatpush3.msra.mxu0 %v1700_v11  ;;  %v1710_v33 = vadd.f32 %v1057_v9, %v249_v17  ;;  %v180_v34 = vadd.f32 %v1024_v16, %v1008_v31  ;;  %vm200_vm9 = vcmp.eq.s32.totalorder %v1494_v18, %v1508_v23  ;;  %vm268_vm10 = vcmp.eq.s32.totalorder %v1494_v18, %v1510_v24 }
  0x3b   :  { %1210 = vmatpush3.msra.mxu1 %v445_v12  ;;  %1184 = vmatprep.subr.mxu0 %v1429_v2  ;;  %v451_v36 = vsub.f32 %v1696_v10, %v450_v30  ;;  %v1040_v37 = vsel %vm200_vm9, 1.0, %v1429_v2  ;;  %v1056_v39 = vsel %vm268_vm10, 1.0, %v1429_v2  ;;  %v1724_v40 = vsub.f32 %v1627_v38, %v1645_v44 }
  0x3c   :  { %1211 = vmatprep.subr.mxu1 %v1429_v2  ;;  %v1728_v41 = vand.u32 4294901760, %v1710_v33  ;;  %v248_v18 = vadd.f32 %v1040_v37, %v180_v34  ;;  %vm79_vm11 = vcmp.eq.s32.totalorder %v1497_v19, %v1504_v21  ;;  %vm131_vm12 = vcmp.eq.s32.totalorder %v1497_v19, %v1506_v22 }
  0x3d   :  { %v452_v42 = vand.u32 4294901760, %v451_v36  ;;  %v457_v14 = vand.u32 4294901760, %v1724_v40  ;;  %v1007_v45 = vsel %vm79_vm11, 1.0, %v1429_v2  ;;  %v1023_v38 = vsel %vm131_vm12, 1.0, %v1429_v2 }
  0x3e   :  { %1185 = vmatpush3.msra.mxu0 %v1728_v41  ;;  %v1738_v47 = vadd.f32 %v1056_v39, %v248_v18  ;;  %v179_v49 = vadd.f32 %v1023_v38, %v1007_v45  ;;  %vm199_vm13 = vcmp.eq.s32.totalorder %v1497_v19, %v1508_v23  ;;  %vm267_vm14 = vcmp.eq.s32.totalorder %v1497_v19, %v1510_v24 }
  0x3f   :  { %1212 = vmatpush3.msra.mxu1 %v452_v42  ;;  %1186 = vmatprep.subr.mxu0 %v1429_v2  ;;  %v458_v51 = vsub.f32 %v1724_v40, %v457_v14  ;;  %v1039_v52 = vsel %vm199_vm13, 1.0, %v1429_v2  ;;  %v1055_v53 = vsel %vm267_vm14, 1.0, %v1429_v2  ;;  %v1752_v55 = vsub.f32 %v1655_v50, %v1672_v57 }
  0x40   :  { %1213 = vmatprep.subr.mxu1 %v1429_v2  ;;  %v1756_v15 = vand.u32 4294901760, %v1738_v47  ;;  %v247_v19 = vadd.f32 %v1039_v52, %v179_v49  ;;  %vm78_vm15 = vcmp.eq.s32.totalorder %v1500_v20, %v1504_v21  ;;  %vm130_vm1 = vcmp.eq.s32.totalorder %v1500_v20, %v1506_v22 }
  0x41   :  { %v459_v58 = vand.u32 4294901760, %v458_v51  ;;  %v464_v60 = vand.u32 4294901760, %v1752_v55  ;;  %v1006_v63 = vsel %vm78_vm15, 1.0, %v1429_v2  ;;  %v1022_v50 = vsel %vm130_vm1, 1.0, %v1429_v2 }
  0x42   :  { %1187 = vmatpush3.msra.mxu0 %v1756_v15  ;;  %v1766_v1 = vadd.f32 %v1055_v53, %v247_v19  ;;  %v178_v4 = vadd.f32 %v1022_v50, %v1006_v63  ;;  %vm198_vm2 = vcmp.eq.s32.totalorder %v1500_v20, %v1508_v23  ;;  %vm266_vm3 = vcmp.eq.s32.totalorder %v1500_v20, %v1510_v24 }
  0x43   :  { %1214 = vmatpush3.msra.mxu1 %v459_v58  ;;  %1188 = vmatprep.subr.mxu0 %v1429_v2  ;;  %v465_v8 = vsub.f32 %v1752_v55, %v464_v60  ;;  %v1038_v9 = vsel %vm198_vm2, 1.0, %v1429_v2  ;;  %v1054_v17 = vsel %vm266_vm3, 1.0, %v1429_v2  ;;  %v1780_v12 = vsub.f32 %v1682_v0, %v1700_v11 }
  0x44   :  { %1215 = vmatprep.subr.mxu1 %v1429_v2  ;;  %v1784_v31 = vand.u32 4294901760, %v1766_v1  ;;  %v246_v20 = vadd.f32 %v1038_v9, %v178_v4  ;;  %vm77_vm4 = vcmp.eq.s32.totalorder %v1518_v26, %v1504_v21  ;;  %vm129_vm5 = vcmp.eq.s32.totalorder %v1518_v26, %v1506_v22 }
  0x45   :  { %v466_v16 = vand.u32 4294901760, %v465_v8  ;;  %v471_v34 = vand.u32 4294901760, %v1780_v12  ;;  %v1005_v36 = vsel %vm77_vm4, 1.0, %v1429_v2  ;;  %v1021_v0 = vsel %vm129_vm5, 1.0, %v1429_v2 }
  0x46   :  { %1189 = vmatpush3.msra.mxu0 %v1784_v31  ;;  %v1794_v37 = vadd.f32 %v1054_v17, %v246_v20  ;;  %v177_v39 = vadd.f32 %v1021_v0, %v1005_v36  ;;  %vm197_vm6 = vcmp.eq.s32.totalorder %v1518_v26, %v1508_v23  ;;  %vm265_vm7 = vcmp.eq.s32.totalorder %v1518_v26, %v1510_v24 }
  0x47   :  { %1216 = vmatpush3.msra.mxu1 %v466_v16  ;;  %1190 = vmatprep.subr.mxu0 %v1429_v2  ;;  %v472_v18 = vsub.f32 %v1780_v12, %v471_v34  ;;  %v1037_v42 = vsel %vm197_vm6, 1.0, %v1429_v2  ;;  %v1053_v45 = vsel %vm265_vm7, 1.0, %v1429_v2  ;;  %v1808_v38 = vsub.f32 %v1710_v33, %v1728_v41 }
  0x48   :  { %1217 = vmatprep.subr.mxu1 %v1429_v2  ;;  %v1812_v49 = vand.u32 4294901760, %v1794_v37  ;;  %v245_v26 = vadd.f32 %v1037_v42, %v177_v39  ;;  %vm76_vm8 = vcmp.eq.s32.totalorder %v1521_v27, %v1504_v21  ;;  %vm128_vm9 = vcmp.eq.s32.totalorder %v1521_v27, %v1506_v22 }
  0x49   :  { %v473_v51 = vand.u32 4294901760, %v472_v18  ;;  %v478_v52 = vand.u32 4294901760, %v1808_v38  ;;  %v1004_v53 = vsel %vm76_vm8, 1.0, %v1429_v2  ;;  %v1020_v33 = vsel %vm128_vm9, 1.0, %v1429_v2 }
  0x4a   :  { %1191 = vmatpush3.msra.mxu0 %v1812_v49  ;;  %v313_v19 = vadd.f32 %v1053_v45, %v245_v26  ;;  %v176_v58 = vadd.f32 %v1020_v33, %v1004_v53  ;;  %vm196_vm10 = vcmp.eq.s32.totalorder %v1521_v27, %v1508_v23  ;;  %vm264_vm11 = vcmp.eq.s32.totalorder %v1521_v27, %v1510_v24 }
  0x4b   :  { %1218 = vmatpush3.msra.mxu1 %v473_v51  ;;  %1192 = vmatprep.subr.mxu0 %v1429_v2  ;;  %v479_v63 = vsub.f32 %v1808_v38, %v478_v52  ;;  %v1036_v50 = vsel %vm196_vm10, 1.0, %v1429_v2  ;;  %v1052_v4 = vsel %vm264_vm11, 1.0, %v1429_v2  ;;  %v1834_v8 = vsub.f32 %v1738_v47, %v1756_v15 }
  0x4c   :  { %1219 = vmatprep.subr.mxu1 %v1429_v2  ;;  %v1837_v9 = vand.u32 4294901760, %v313_v19  ;;  %v244_v27 = vadd.f32 %v1036_v50, %v176_v58  ;;  %vm75_vm12 = vcmp.eq.s32.totalorder %v1524_v28, %v1504_v21  ;;  %vm127_vm13 = vcmp.eq.s32.totalorder %v1524_v28, %v1506_v22 }
  0x4d   :  { %v480_v17 = vand.u32 4294901760, %v479_v63  ;;  %v485_v20 = vand.u32 4294901760, %v1834_v8  ;;  %v1003_v16 = vsel %vm75_vm12, 1.0, %v1429_v2  ;;  %v1019_v36 = vsel %vm127_vm13, 1.0, %v1429_v2 }
  0x4e   :  { %1193 = vmatpush3.msra.mxu0 %v1837_v9  ;;  %v312_v47 = vadd.f32 %v1052_v4, %v244_v27  ;;  %v175_v0 = vadd.f32 %v1019_v36, %v1003_v16  ;;  %vm195_vm14 = vcmp.eq.s32.totalorder %v1524_v28, %v1508_v23  ;;  %vm263_vm15 = vcmp.eq.s32.totalorder %v1524_v28, %v1510_v24 }
  0x4f   :  { %1220 = vmatpush3.msra.mxu1 %v480_v17  ;;  %1194 = vmatprep.subr.mxu0 %v1429_v2  ;;  %v486_v39 = vsub.f32 %v1834_v8, %v485_v20  ;;  %v1035_v18 = vsel %vm195_vm14, 1.0, %v1429_v2  ;;  %v1051_v42 = vsel %vm263_vm15, 1.0, %v1429_v2  ;;  %v1859_v45 = vsub.f32 %v1766_v1, %v1784_v31 }
  0x50   :  { %1221 = vmatprep.subr.mxu1 %v1429_v2  ;;  %v1862_v26 = vand.u32 4294901760, %v312_v47  ;;  %v243_v28 = vadd.f32 %v1035_v18, %v175_v0  ;;  %vm74_vm1 = vcmp.eq.s32.totalorder %v1462_v3, %v1504_v21  ;;  %vm126_vm2 = vcmp.eq.s32.totalorder %v1462_v3, %v1506_v22 }
  0x51   :  { %v487_v51 = vand.u32 4294901760, %v486_v39  ;;  %v492_v53 = vand.u32 4294901760, %v1859_v45  ;;  %v1002_v33 = vsel %vm74_vm1, 1.0, %v1429_v2  ;;  %v1018_v58 = vsel %vm126_vm2, 1.0, %v1429_v2 }
  0x52   :  { %1195 = vmatpush3.msra.mxu0 %v1862_v26  ;;  %v311_v1 = vadd.f32 %v1051_v42, %v243_v28  ;;  %v174_v63 = vadd.f32 %v1018_v58, %v1002_v33  ;;  %vm194_vm3 = vcmp.eq.s32.totalorder %v1462_v3, %v1508_v23  ;;  %vm262_vm4 = vcmp.eq.s32.totalorder %v1462_v3, %v1510_v24 }
  0x53   :  { %1222 = vmatpush3.msra.mxu1 %v487_v51  ;;  %1196 = vmatprep.subr.mxu0 %v1429_v2  ;;  %v493_v21 = vsub.f32 %v1859_v45, %v492_v53  ;;  %v1034_v22 = vsel %vm194_vm3, 1.0, %v1429_v2  ;;  %v1050_v50 = vsel %vm262_vm4, 1.0, %v1429_v2  ;;  %v1884_v4 = vsub.f32 %v1794_v37, %v1812_v49  ;;  %v975_v37 = vld [vmem:[#allocation3] sm:$0x1] }
  0x54   :  { %1223 = vmatprep.subr.mxu1 %v1429_v2  ;;  %v1887_v23 = vand.u32 4294901760, %v311_v1  ;;  %v242_v24 = vadd.f32 %v1034_v22, %v174_v63  ;;  %v1891_v27 = vsub.f32 %v1515_v25, %v1527_v29  ;;  %v1894_v17 = vsub.f32 %v313_v19, %v1837_v9 }
  0x55   :  { %v494_v16 = vand.u32 4294901760, %v493_v21  ;;  %v499_v36 = vand.u32 4294901760, %v1884_v4  ;;  %v1898_v0 = vsub.f32 %v312_v47, %v1862_v26  ;;  %v1431_v28 = vmov 0  }
  0x56   :  { %1197 = vmatpush3.msra.mxu0 %v1887_v23  ;;  %v310_v39 = vadd.f32 %v1050_v50, %v242_v24  ;;  %v411_v18 = vand.u32 4294901760, %v1891_v27  ;;  %v506_v42 = vand.u32 4294901760, %v1894_v17  ;;  %v1904_v25 = vsub.f32 %v311_v1, %v1887_v23  ;;  %1383 = vset.pattern.permute.xlu0 %v1431_v28 }
  0x57   :  { %1224 = vmatpush3.msra.mxu1 %v494_v16  ;;  %1198 = vmatprep.subr.mxu0 %v1429_v2  ;;  %v500_v19 = vsub.f32 %v1884_v4, %v499_v36  ;;  %v513_v47 = vand.u32 4294901760, %v1898_v0 }
  0x58   :  { %1225 = vmatprep.subr.mxu1 %v1429_v2  ;;  %v1912_v51 = vand.u32 4294901760, %v310_v39  ;;  %v412_v33 = vsub.f32 %v1891_v27, %v411_v18  ;;  %v507_v58 = vsub.f32 %v1894_v17, %v506_v42  ;;  %v520_v1 = vand.u32 4294901760, %v1904_v25  ;;  %978 = vperm.xlu0 %1383, %v975_v37  }
  0x59   :  { %v501_v63 = vand.u32 4294901760, %v500_v19  ;;  %v514_v21 = vsub.f32 %v1898_v0, %v513_v47 }
  0x5a   :  { %1199 = vmatpush3.msra.mxu0 %v1912_v51  ;;  %v413_v22 = vand.u32 4294901760, %v412_v33  ;;  %v508_v50 = vand.u32 4294901760, %v507_v58  ;;  %v521_v24 = vsub.f32 %v1904_v25, %v520_v1  ;;  %v1929_v16 = vsub.f32 %v310_v39, %v1912_v51 }
  0x5b   :  { %1226 = vmatpush3.msra.mxu1 %v501_v63  ;;  %1238 = vmatprep.subr.mxu0 %v1429_v2  ;;  %v515_v37 = vand.u32 4294901760, %v514_v21 }
  0x5c   :  { %1227 = vmatprep.subr.mxu1 %v1429_v2  ;;  %1201 = vmatmul.mubr.f32.vlgmr.msra.gmra.mxu0 %v413_v22  ;;  %v527_v28 = vand.u32 4294901760, %v1929_v16  ;;  %v522_v19 = vand.u32 4294901760, %v521_v24 }
  0x5d   :  { %1228 = vmatpush3.msra.mxu1 %v508_v50  ;;  %1239 = vmatpush3.msra.mxu0 %v1583_v61 }
  0x5e   :  { %1229 = vmatprep.subr.mxu1 %v1429_v2  ;;  %1240 = vmatprep.subr.mxu0 %v1429_v2  ;;  %v528_v39 = vsub.f32 %v1929_v16, %v527_v28 }
  0x5f   :  { %1230 = vmatpush3.msra.mxu1 %v515_v37  ;;  %1241 = vmatpush3.msra.mxu0 %v1614_v32 }
  0x60   :  { %1231 = vmatprep.subr.mxu1 %v1429_v2  ;;  %1242 = vmatprep.subr.mxu0 %v1429_v2  ;;  %v529_v33 = vand.u32 4294901760, %v528_v39 }
  0x61   :  { %1232 = vmatpush3.msra.mxu1 %v522_v19  ;;  %1243 = vmatpush3.msra.mxu0 %v1641_v43 }
  0x62   :  { %1233 = vmatprep.subr.mxu1 %v1429_v2  ;;  %1244 = vmatprep.subr.mxu0 %v1429_v2 }
  0x63   :  { %1234 = vmatpush3.msra.mxu1 %v529_v33  ;;  %1245 = vmatpush3.msra.mxu0 %v1668_v56 }
  0x64   :  { %1236 = vmatmul.mubr.f32.vlgmr.msra.gmra.mxu1 %v1527_v29  ;;  %1246 = vmatprep.subr.mxu0 %v1429_v2 }
  0x65   :  { %1273 = vmatprep.subr.mxu1 %v1429_v2  ;;  %1247 = vmatpush3.msra.mxu0 %v1696_v10 }
  0x66   :  { %1274 = vmatpush3.msra.mxu1 %v1557_v48  ;;  %1248 = vmatprep.subr.mxu0 %v1429_v2 }
  0x67   :  { %1275 = vmatprep.subr.mxu1 %v1429_v2  ;;  %1249 = vmatpush3.msra.mxu0 %v1724_v40 }
  0x68   :  { %1276 = vmatpush3.msra.mxu1 %v1566_v54  ;;  %1250 = vmatprep.subr.mxu0 %v1429_v2 }
  0x69   :  { %1277 = vmatprep.subr.mxu1 %v1429_v2  ;;  %1251 = vmatpush3.msra.mxu0 %v1752_v55 }
  0x6a   :  { %1278 = vmatpush3.msra.mxu1 %v1586_v62  ;;  %1252 = vmatprep.subr.mxu0 %v1429_v2 }
  0x6b   :  { %1279 = vmatprep.subr.mxu1 %v1429_v2  ;;  %1253 = vmatpush3.msra.mxu0 %v1780_v12 }
  0x6c   :  { %1280 = vmatpush3.msra.mxu1 %v1596_v7  ;;  %1254 = vmatprep.subr.mxu0 %v1429_v2 }
  0x6d   :  { %1281 = vmatprep.subr.mxu1 %v1429_v2  ;;  %1255 = vmatpush3.msra.mxu0 %v1808_v38 }
  0x6e   :  { %1282 = vmatpush3.msra.mxu1 %v1622_v13  ;;  %1256 = vmatprep.subr.mxu0 %v1429_v2 }
  0x6f   :  { %1283 = vmatprep.subr.mxu1 %v1429_v2  ;;  %1257 = vmatpush3.msra.mxu0 %v1834_v8 }
  0x70   :  { %1284 = vmatpush3.msra.mxu1 %v1645_v44  ;;  %1258 = vmatprep.subr.mxu0 %v1429_v2 }
  0x71   :  { %1285 = vmatprep.subr.mxu1 %v1429_v2  ;;  %1259 = vmatpush3.msra.mxu0 %v1859_v45 }
  0x72   :  { %1286 = vmatpush3.msra.mxu1 %v1672_v57  ;;  %1260 = vmatprep.subr.mxu0 %v1429_v2 }
  0x73   :  { %1287 = vmatprep.subr.mxu1 %v1429_v2  ;;  %1261 = vmatpush3.msra.mxu0 %v1884_v4 }
  0x74   :  { %1288 = vmatpush3.msra.mxu1 %v1700_v11  ;;  %1262 = vmatprep.subr.mxu0 %v1429_v2 }
  0x75   :  { %1289 = vmatprep.subr.mxu1 %v1429_v2  ;;  %1263 = vmatpush3.msra.mxu0 %v1894_v17 }
  0x76   :  { %1290 = vmatpush3.msra.mxu1 %v1728_v41  ;;  %1264 = vmatprep.subr.mxu0 %v1429_v2 }
  0x77   :  { %1291 = vmatprep.subr.mxu1 %v1429_v2  ;;  %1265 = vmatpush3.msra.mxu0 %v1898_v0 }
  0x78   :  { %1292 = vmatpush3.msra.mxu1 %v1756_v15  ;;  %1266 = vmatprep.subr.mxu0 %v1429_v2 }
  0x79   :  { %1293 = vmatprep.subr.mxu1 %v1429_v2  ;;  %1267 = vmatpush3.msra.mxu0 %v1904_v25 }
  0x7a   :  { %1294 = vmatpush3.msra.mxu1 %v1784_v31  ;;  %1268 = vmatprep.subr.mxu0 %v1429_v2 }
  0x7b   :  { %1295 = vmatprep.subr.mxu1 %v1429_v2  ;;  %1269 = vmatpush3.msra.mxu0 %v1929_v16 }
  0x7c   :  { %1270 = vmatprep.mubr.msk.f32.mxu0 %vm1430_vm0, %v1429_v2  ;;  %1296 = vmatpush3.msra.mxu1 %v1812_v49 }
  0x7d   :  { %1271 = vmatmul.mubr.f32.vlgmr.msra.gmra.mxu0 %v1891_v27  ;;  %1297 = vmatprep.subr.mxu1 %v1429_v2 }
  0x7e   :  { %1308 = vmatprep.subr.mxu0 %v1429_v2  ;;  %1298 = vmatpush3.msra.mxu1 %v1837_v9 }
  0x7f   :  { %1309 = vmatpush3.msra.mxu0 %v422_v6  ;;  %1299 = vmatprep.subr.mxu1 %v1429_v2 }
  0x80   :  { %1310 = vmatprep.subr.mxu0 %v1429_v2  ;;  %1300 = vmatpush3.msra.mxu1 %v1862_v26 }
  0x81   :  { %1311 = vmatpush3.msra.mxu0 %v429_v35  ;;  %1301 = vmatprep.subr.mxu1 %v1429_v2 }
  0x82   :  { %1312 = vmatprep.subr.mxu0 %v1429_v2  ;;  %1302 = vmatpush3.msra.mxu1 %v1887_v23 }
  0x83   :  { %1313 = vmatpush3.msra.mxu0 %v436_v46  ;;  %1303 = vmatprep.subr.mxu1 %v1429_v2 }
  0x84   :  { %1314 = vmatprep.subr.mxu0 %v1429_v2  ;;  %1304 = vmatpush3.msra.mxu1 %v1912_v51 }
  0x85   :  { %1305 = vmatprep.mubr.msk.f32.mxu1 %vm1430_vm0, %v1429_v2  ;;  %1315 = vmatpush3.msra.mxu0 %v443_v59  ;;  %v326_v59 = vld [vmem:[#allocation2] sm:$0x1] }
  0x86   :  { %1306 = vmatmul.mubr.f32.vlgmr.msra.gmra.mxu1 %v411_v18  ;;  %1316 = vmatprep.subr.mxu0 %v1429_v2 }
  0x87   :  { %1343 = vmatprep.subr.mxu1 %v1429_v2  ;;  %1317 = vmatpush3.msra.mxu0 %v450_v30 }
  0x88   :  { %1344 = vmatpush3.msra.mxu1 %v1557_v48  ;;  %1318 = vmatprep.subr.mxu0 %v1429_v2 }
  0x89   :  { %1345 = vmatprep.subr.mxu1 %v1429_v2  ;;  %1319 = vmatpush3.msra.mxu0 %v457_v14 }
  0x8a   :  { %1346 = vmatpush3.msra.mxu1 %v1566_v54  ;;  %1320 = vmatprep.subr.mxu0 %v1429_v2 }
  0x8b   :  { %1347 = vmatprep.subr.mxu1 %v1429_v2  ;;  %1321 = vmatpush3.msra.mxu0 %v464_v60 }
  0x8c   :  { %1348 = vmatpush3.msra.mxu1 %v1586_v62  ;;  %1322 = vmatprep.subr.mxu0 %v1429_v2 }
  0x8d   :  { %1349 = vmatprep.subr.mxu1 %v1429_v2  ;;  %1323 = vmatpush3.msra.mxu0 %v471_v34 }
  0x8e   :  { %1350 = vmatpush3.msra.mxu1 %v1596_v7  ;;  %1324 = vmatprep.subr.mxu0 %v1429_v2 }
  0x8f   :  { %1351 = vmatprep.subr.mxu1 %v1429_v2  ;;  %1325 = vmatpush3.msra.mxu0 %v478_v52 }
  0x90   :  { %1352 = vmatpush3.msra.mxu1 %v1622_v13  ;;  %1326 = vmatprep.subr.mxu0 %v1429_v2 }
  0x91   :  { %1353 = vmatprep.subr.mxu1 %v1429_v2  ;;  %1327 = vmatpush3.msra.mxu0 %v485_v20 }
  0x92   :  { %1354 = vmatpush3.msra.mxu1 %v1645_v44  ;;  %1328 = vmatprep.subr.mxu0 %v1429_v2 }
  0x93   :  { %1355 = vmatprep.subr.mxu1 %v1429_v2  ;;  %1329 = vmatpush3.msra.mxu0 %v492_v53 }
  0x94   :  { %1356 = vmatpush3.msra.mxu1 %v1672_v57  ;;  %1330 = vmatprep.subr.mxu0 %v1429_v2 }
  0x95   :  { %1357 = vmatprep.subr.mxu1 %v1429_v2  ;;  %1331 = vmatpush3.msra.mxu0 %v499_v36 }
  0x96   :  { %1358 = vmatpush3.msra.mxu1 %v1700_v11  ;;  %1332 = vmatprep.subr.mxu0 %v1429_v2 }
  0x97   :  { %1359 = vmatprep.subr.mxu1 %v1429_v2  ;;  %1333 = vmatpush3.msra.mxu0 %v506_v42 }
  0x98   :  { %1360 = vmatpush3.msra.mxu1 %v1728_v41  ;;  %1334 = vmatprep.subr.mxu0 %v1429_v2 }
  0x99   :  { %1361 = vmatprep.subr.mxu1 %v1429_v2  ;;  %1335 = vmatpush3.msra.mxu0 %v513_v47 }
  0x9a   :  { %1362 = vmatpush3.msra.mxu1 %v1756_v15  ;;  %1336 = vmatprep.subr.mxu0 %v1429_v2 }
  0x9b   :  { %1363 = vmatprep.subr.mxu1 %v1429_v2  ;;  %1337 = vmatpush3.msra.mxu0 %v520_v1 }
  0x9c   :  { %1364 = vmatpush3.msra.mxu1 %v1784_v31  ;;  %1338 = vmatprep.subr.mxu0 %v1429_v2 }
  0x9d   :  { %1365 = vmatprep.subr.mxu1 %v1429_v2  ;;  %1339 = vmatpush3.msra.mxu0 %v527_v28 }
  0x9e   :  { %1340 = vmatprep.mubr.msk.f32.mxu0 %vm1430_vm0, %v1429_v2  ;;  %1366 = vmatpush3.msra.mxu1 %v1812_v49 }
  0x9f   :  { %1341 = vmatmul.mubr.f32.vlgmr.msra.gmra.mxu0 %v1527_v29  ;;  %1367 = vmatprep.subr.mxu1 %v1429_v2 }
  0xa0   :  { %1368 = vmatpush3.msra.mxu1 %v1837_v9  ;;  %1375 = vmatprep.mubr.msk.f32.mxu1 %vm1430_vm0, %v1429_v2 }
  0xa1   :  { %1369 = vmatprep.subr.mxu1 %v1429_v2 }
  0xa2   :  { %1370 = vmatpush3.msra.mxu1 %v1862_v26 }
  0xa3   :  { %1371 = vmatprep.subr.mxu1 %v1429_v2 }
  0xa4   :  { %1372 = vmatpush3.msra.mxu1 %v1887_v23 }
  0xa5   :  { %1373 = vmatprep.subr.mxu1 %v1429_v2 }
  0xa6   :  { %1374 = vmatpush3.msra.mxu1 %v1912_v51 }
  0xa7   :  { %1376 = vmatmul.mubr.f32.vlgmr.msra.gmra.mxu1 %v1527_v29 }
  0xd3   :  { %v979_v29 = vpop.permute.xlu0 %978 }
  0xd4   :  { %v984_v40 = vrot.slane %v979_v29, %v72_v5 }
 0x11c   :  { %v415_v48 = vpop.f32.mrf.mxu0 }
 0x11e   :  { %v1202_v54 = vpop.f32.mrf.mxu0 }
 0x124   :  { %v566_v61 = vpop.f32.mrf.mxu1 }
 0x125   :  { %v567_v43 = vadd.f32 %v566_v61, %v415_v48 }
 0x126   :  { %v1237_v62 = vpop.f32.mrf.mxu1 }
 0x13d   :  { %v670_v6 = vpop.f32.mrf.mxu0 }
 0x13e   :  { %v671_v46 = vadd.f32 %v670_v6, %v567_v43 }
 0x13f   :  { %v1272_v7 = vpop.f32.mrf.mxu0 }
 0x146   :  { %v759_v32 = vpop.f32.mrf.mxu1 }
 0x147   :  { %v760_v56 = vadd.f32 %v759_v32, %v671_v46 }
 0x148   :  { %v1307_v13 = vpop.f32.mrf.mxu1 }
 0x15f   :  { %v878_v35 = vpop.f32.mrf.mxu0 }
 0x160   :  { %v879_v57 = vadd.f32 %v878_v35, %v760_v56 }
 0x161   :  { %v1342_v44 = vpop.f32.mrf.mxu0 }
 0x167   :  { %v965_v2 = vpop.f32.mrf.mxu1 }
 0x168   :  { %v966_v10 = vadd.f32 %v965_v2, %v879_v57 }
 0x169   :  { %v1377_v11 = vpop.f32.mrf.mxu1 }
 0x16a   :  { %v969_v30 = vadd.f32 %v966_v10, %v326_v59 }
 0x16c   :  { %970 = vst [vmem:[#allocation2] sm:$0x1] %v969_v30 }
 0x173   :  { %v974_v41 = vld [vmem:[#allocation2] sm:$0x1] }
 0x174   :  { %v985_v14 = vadd.f32 %v984_v40, %v974_v41 }
 0x176   :  { %986 = vst [vmem:[#allocation7] sm:$0x1] %v985_v14 }
 0x177   :  { %1415 = shalt.err (!%p1412_p9)
}
 0x178   :  { %996 = dma.vmem_to_hbm [thread:$0]  %s994_s19, 16, %s2105_s3, [#allocation6]  }
 0x179   :  { %1426 = dma.done.wait [#allocation6], 16  }
 0x17a   :  { %1427 = vsyncadd [#allocation6], 4294967280 }
 0x17b   :  { %1000 = vsyncpa [#allocation5], 1 }
 0x17c   :  { %1001 = vsyncpa [#allocation6], 1 }

</bundles_post_ra>
